<compile_context>
chip_gen: v7x
topology: tpu7x:2x2x1
jax: 0.10.0
libtpu: 0.0.40
codegen_flags: <defaults>
</compile_context>

<pallas_src>
import functools

import jax
import jax.numpy as jnp
from jax.experimental import pallas as pl
from jax.experimental.pallas import tpu as pltpu

EPS = 0.001
LANE = 128


def _jaccard_partial_kernel(*refs, block_rows, total_rows, need_mask, has_weight):
    """Accumulates lane-wide per-sample partials of `sum(p*t)` and `sum(p+t)`.

    Inputs are (N, block_rows, 128) tiles of the (N, R, 128) operands; outputs
    are per-partition (N, 128) accumulators (squeezed leading grid dim).
    """
    if has_weight:
        p_ref, t_ref, w_ref, inter_ref, total_ref = refs
    else:
        p_ref, t_ref, inter_ref, total_ref = refs
        w_ref = None

    k = pl.program_id(1)

    @pl.when(k == 0)
    def _():
        inter_ref[...] = jnp.zeros_like(inter_ref)
        total_ref[...] = jnp.zeros_like(total_ref)

    p = p_ref[...].astype(jnp.float32)
    t = t_ref[...].astype(jnp.float32)
    if has_weight:
        w = w_ref[...].astype(jnp.float32)
        p = p * w
        t = t * w

    prod = p * t
    both = p + t

    if need_mask:
        # Logical (unclamped) block id -> starting row of this tile. Rows at or
        # beyond `total_rows` (edge-of-array padding, or a fully out-of-range
        # step whose DMA index was clamped) contribute zero.
        step = pl.program_id(0) * pl.num_programs(1) + k
        row0 = step * block_rows
        rows = row0 + jax.lax.broadcasted_iota(jnp.int32, prod.shape, 1)
        valid = rows < total_rows
        prod = jnp.where(valid, prod, 0.0)
        both = jnp.where(valid, both, 0.0)

    # Only the sublane (row) axis is reduced per tile; the 128-lane reduction
    # is deferred to the epilogue outside the hot loop.
    inter_ref[...] += jnp.sum(prod, axis=1)
    total_ref[...] += jnp.sum(both, axis=1)


def jaccard_loss(inputs, targets, weight=None, size_average=True, block_rows=None):
    """Pallas TPU implementation of JaccardLoss.forward.

    inputs/targets: arrays with a leading batch dim N (e.g. NCHW).
    weight: optional per-element weight with the same total size (as in the
            PyTorch module); streamed into the kernel, not pre-applied.
    block_rows: optional override of the feature tile height (testing hook).
    """
    n = inputs.shape[0]
    has_weight = weight is not None

    f = 1
    for d in inputs.shape[1:]:
        f *= d
    r = pl.cdiv(f, LANE)
    f_pad = r * LANE

    def prep(x):
        x = x.reshape(n, -1)
        if x.shape[1] != f_pad:
            # TODO(synk): in-kernel lane-tail masking would avoid this HBM copy
            # for feature sizes that are not a multiple of 128.
            x = jnp.pad(x, ((0, 0), (0, f_pad - x.shape[1])))
        return x.reshape(n, r, LANE)

    streams = [prep(inputs), prep(targets)]
    if has_weight:
        streams.append(prep(weight))

    # ---- tile sizing: biggest blocks that keep 2x-buffered inputs <= ~24 MiB.
    bytes_per_row = n * LANE * sum(jnp.dtype(s.dtype).itemsize for s in streams)
    budget = 24 * 1024 * 1024
    tr = max(8, (budget // (2 * bytes_per_row)) // 8 * 8)
    if block_rows is not None:
        tr = max(8, (block_rows // 8) * 8)
    if r >= 8:
        tr = min(tr, (r // 8) * 8)
    else:
        tr = r  # block spans the full (tiny) row dim

    k_blocks = pl.cdiv(r, tr)
    p_parts = 2 if k_blocks >= 2 else 1          # feed both TensorCores on v7x
    k_steps = pl.cdiv(k_blocks, p_parts)
    need_mask = (k_blocks * tr != r) or (p_parts * k_steps != k_blocks)

    def in_map(pp, kk):
        # Clamp so a fully out-of-range step of the last partition re-reads the
        # last valid block (its contribution is masked to zero in-kernel).
        return (0, jnp.minimum(pp * k_steps + kk, k_blocks - 1), 0)

    def out_map(pp, kk):
        return (pp, 0, 0)

    in_specs = [pl.BlockSpec((n, tr, LANE), in_map) for _ in streams]
    out_specs = [
        pl.BlockSpec((None, n, LANE), out_map),
        pl.BlockSpec((None, n, LANE), out_map),
    ]
    out_shape = (
        jax.ShapeDtypeStruct((p_parts, n, LANE), jnp.float32),
        jax.ShapeDtypeStruct((p_parts, n, LANE), jnp.float32),
    )

    kernel = functools.partial(
        _jaccard_partial_kernel,
        block_rows=tr,
        total_rows=r,
        need_mask=need_mask,
        has_weight=has_weight,
    )

    inter_out, total_out = pl.pallas_call(
        kernel,
        out_shape=out_shape,
        grid_spec=pltpu.PrefetchScalarGridSpec(
            num_scalar_prefetch=0,
            grid=(p_parts, k_steps),
            in_specs=in_specs,
            out_specs=out_specs,
        ),
        compiler_params=pltpu.CompilerParams(
            dimension_semantics=("parallel", "arbitrary"),
            vmem_limit_bytes=32 * 1024 * 1024,
        ),
    )(*streams)

    # Tiny epilogue: combine per-partition, per-lane partials -> scalar loss.
    inter = jnp.sum(inter_out, axis=(0, 2))      # (N,)
    total = jnp.sum(total_out, axis=(0, 2))      # (N,)
    scores = (inter + EPS) / (total - inter + EPS)
    score = jnp.sum(scores)
    if size_average:
        score = score / jnp.float32(n)
    return jnp.clip(score, 0.0, 1.0)


def _jaccard_ref(inputs, targets, weight=None, size_average=True):
    n = inputs.shape[0]
    p = inputs.reshape(n, -1).astype(jnp.float32)
    t = targets.reshape(n, -1).astype(jnp.float32)
    if weight is not None:
        w = weight.reshape(n, -1).astype(jnp.float32)
        p = p * w
        t = t * w
    inter = jnp.sum(p * t, axis=1)
    scores = (inter + EPS) / (jnp.sum(p + t, axis=1) - inter + EPS)
    score = jnp.sum(scores)
    if size_average:
        score = score / n
    return jnp.clip(score, 0.0, 1.0)


if __name__ == "__main__":
    key = jax.random.PRNGKey(0)
    k1, k2, k3, k4, k5, k6, k7 = jax.random.split(key, 7)

    # Case A: basic NCHW f32, no weight (single tile per partition).
    xa = jax.random.uniform(k1, (2, 4, 16, 16), dtype=jnp.float32)
    ya = (jax.random.uniform(k2, (2, 4, 16, 16)) > 0.5).astype(jnp.float32)
    got = jax.block_until_ready(jaccard_loss(xa, ya))
    ref = _jaccard_ref(xa, ya)
    assert jnp.allclose(got, ref, atol=1e-5, rtol=1e-5), ("A", got, ref)

    # Case B: multi-tile + both grid partitions + masked partial edge tile.
    xb = jax.random.uniform(k3, (2, 3, 24, 48), dtype=jnp.float32)   # F = 3456 = 27*128
    yb = (jax.random.uniform(k4, (2, 3, 24, 48)) > 0.5).astype(jnp.float32)
    got = jax.block_until_ready(jaccard_loss(xb, yb, size_average=False, block_rows=8))
    ref = _jaccard_ref(xb, yb, size_average=False)
    assert jnp.allclose(got, ref, atol=1e-5, rtol=1e-5), ("B", got, ref)

    # Case C: odd block count -> one fully out-of-range (clamped + masked) step.
    xc = jax.random.uniform(k5, (2, 5, 16, 32), dtype=jnp.float32)   # F = 2560 = 20*128
    yc = (jax.random.uniform(k6, (2, 5, 16, 32)) > 0.5).astype(jnp.float32)
    got = jax.block_until_ready(jaccard_loss(xc, yc, block_rows=8))
    ref = _jaccard_ref(xc, yc)
    assert jnp.allclose(got, ref, atol=1e-5, rtol=1e-5), ("C", got, ref)

    # Case D: bf16 inputs streamed natively + fused f32 per-element weight.
    xd = xa.astype(jnp.bfloat16)
    yd = ya.astype(jnp.bfloat16)
    wd = jax.random.uniform(k7, (2, 4, 16, 16), dtype=jnp.float32)
    got = jax.block_until_ready(jaccard_loss(xd, yd, weight=wd))
    ref = _jaccard_ref(xd, yd, weight=wd)
    assert jnp.allclose(got, ref, atol=1e-4, rtol=1e-4), ("D", got, ref)

    # Case E: feature size not a multiple of 128 (pad fallback, tiny R).
    xe = jax.random.uniform(k1, (3, 3, 10, 10), dtype=jnp.float32)   # F = 300
    ye = (jax.random.uniform(k2, (3, 3, 10, 10)) > 0.5).astype(jnp.float32)
    got = jax.block_until_ready(jaccard_loss(xe, ye))
    ref = _jaccard_ref(xe, ye)
    assert jnp.allclose(got, ref, atol=1e-5, rtol=1e-5), ("E", got, ref)

    print("KERNEL_OK")
</pallas_src>

<mosaic_0001>
module attributes {stable_mosaic.version = 11 : i64} {
  func.func @_jaccard_partial_kernel(%arg0: i32, %arg1: i32, %arg2: memref<2x8x128xf32, #tpu.memory_space<vmem>>, %arg3: memref<2x8x128xf32, #tpu.memory_space<vmem>>, %arg4: memref<1x2x128xf32, #tpu.memory_space<vmem>>, %arg5: memref<1x2x128xf32, #tpu.memory_space<vmem>>) attributes {dimension_semantics = [#tpu.dimension_semantics<parallel>, #tpu.dimension_semantics<arbitrary>], iteration_bounds = array<i64: 1, 1>, scalar_prefetch = 0 : i64, scratch_operands = 0 : i64, tpu.core_type = #tpu.core_type<tc>, window_params = [{transform_indices = @transform_0, window_bounds = array<i64: 2, 8, 128>}, {transform_indices = @transform_1, window_bounds = array<i64: 2, 8, 128>}, {transform_indices = @transform_2, window_bounds = array<i64: 1, 2, 128>}, {transform_indices = @transform_3, window_bounds = array<i64: 1, 2, 128>}]} {
    %c0_i32 = arith.constant 0 : i32
    %0 = arith.cmpi eq, %arg1, %c0_i32 : i32
    %1 = arith.extui %0 : i1 to i32
    %c0_i32_0 = arith.constant 0 : i32
    %2 = arith.cmpi ne, %1, %c0_i32_0 : i32
    scf.if %2 {
      %cst_19 = arith.constant 0.000000e+00 : f32
      %21 = vector.broadcast %cst_19 : f32 to vector<2x128xf32>
      %c0_20 = arith.constant 0 : index
      %c0_21 = arith.constant 0 : index
      %c0_22 = arith.constant 0 : index
      %22 = vector.load %arg4[%c0_20, %c0_21, %c0_22] : memref<1x2x128xf32, #tpu.memory_space<vmem>>, vector<1x2x128xf32>
      %23 = vector.shape_cast %22 : vector<1x2x128xf32> to vector<2x128xf32>
      %24 = vector.shape_cast %21 : vector<2x128xf32> to vector<1x2x128xf32>
      tpu.vector_store %arg4[%c0_20, %c0_21, %c0_22], %24 {strides = array<i32>} : memref<1x2x128xf32, #tpu.memory_space<vmem>>, vector<1x2x128xf32>,
      %cst_23 = arith.constant 0.000000e+00 : f32
      %25 = vector.broadcast %cst_23 : f32 to vector<2x128xf32>
      %c0_24 = arith.constant 0 : index
      %c0_25 = arith.constant 0 : index
      %c0_26 = arith.constant 0 : index
      %26 = vector.load %arg5[%c0_24, %c0_25, %c0_26] : memref<1x2x128xf32, #tpu.memory_space<vmem>>, vector<1x2x128xf32>
      %27 = vector.shape_cast %26 : vector<1x2x128xf32> to vector<2x128xf32>
      %28 = vector.shape_cast %25 : vector<2x128xf32> to vector<1x2x128xf32>
      tpu.vector_store %arg5[%c0_24, %c0_25, %c0_26], %28 {strides = array<i32>} : memref<1x2x128xf32, #tpu.memory_space<vmem>>, vector<1x2x128xf32>,
    } else {
    }
    %c0 = arith.constant 0 : index
    %c0_1 = arith.constant 0 : index
    %c0_2 = arith.constant 0 : index
    %3 = vector.load %arg2[%c0, %c0_1, %c0_2] : memref<2x8x128xf32, #tpu.memory_space<vmem>>, vector<2x8x128xf32>
    %c0_3 = arith.constant 0 : index
    %c0_4 = arith.constant 0 : index
    %c0_5 = arith.constant 0 : index
    %4 = vector.load %arg3[%c0_3, %c0_4, %c0_5] : memref<2x8x128xf32, #tpu.memory_space<vmem>>, vector<2x8x128xf32>
    %5 = arith.mulf %3, %4 : vector<2x8x128xf32>
    %6 = arith.addf %3, %4 : vector<2x8x128xf32>
    %c0_6 = arith.constant 0 : index
    %c0_7 = arith.constant 0 : index
    %c0_8 = arith.constant 0 : index
    %7 = vector.load %arg4[%c0_6, %c0_7, %c0_8] : memref<1x2x128xf32, #tpu.memory_space<vmem>>, vector<1x2x128xf32>
    %8 = vector.shape_cast %7 : vector<1x2x128xf32> to vector<2x128xf32>
    %cst = arith.constant dense<0.000000e+00> : vector<2x128xf32>
    %9 = vector.multi_reduction <add>, %5, %cst [1] : vector<2x8x128xf32> to vector<2x128xf32>
    %10 = arith.addf %8, %9 : vector<2x128xf32>
    %c0_9 = arith.constant 0 : index
    %c0_10 = arith.constant 0 : index
    %c0_11 = arith.constant 0 : index
    %11 = vector.load %arg4[%c0_9, %c0_10, %c0_11] : memref<1x2x128xf32, #tpu.memory_space<vmem>>, vector<1x2x128xf32>
    %12 = vector.shape_cast %11 : vector<1x2x128xf32> to vector<2x128xf32>
    %13 = vector.shape_cast %10 : vector<2x128xf32> to vector<1x2x128xf32>
    tpu.vector_store %arg4[%c0_9, %c0_10, %c0_11], %13 {strides = array<i32>} : memref<1x2x128xf32, #tpu.memory_space<vmem>>, vector<1x2x128xf32>,
    %c0_12 = arith.constant 0 : index
    %c0_13 = arith.constant 0 : index
    %c0_14 = arith.constant 0 : index
    %14 = vector.load %arg5[%c0_12, %c0_13, %c0_14] : memref<1x2x128xf32, #tpu.memory_space<vmem>>, vector<1x2x128xf32>
    %15 = vector.shape_cast %14 : vector<1x2x128xf32> to vector<2x128xf32>
    %cst_15 = arith.constant dense<0.000000e+00> : vector<2x128xf32>
    %16 = vector.multi_reduction <add>, %6, %cst_15 [1] : vector<2x8x128xf32> to vector<2x128xf32>
    %17 = arith.addf %15, %16 : vector<2x128xf32>
    %c0_16 = arith.constant 0 : index
    %c0_17 = arith.constant 0 : index
    %c0_18 = arith.constant 0 : index
    %18 = vector.load %arg5[%c0_16, %c0_17, %c0_18] : memref<1x2x128xf32, #tpu.memory_space<vmem>>, vector<1x2x128xf32>
    %19 = vector.shape_cast %18 : vector<1x2x128xf32> to vector<2x128xf32>
    %20 = vector.shape_cast %17 : vector<2x128xf32> to vector<1x2x128xf32>
    tpu.vector_store %arg5[%c0_16, %c0_17, %c0_18], %20 {strides = array<i32>} : memref<1x2x128xf32, #tpu.memory_space<vmem>>, vector<1x2x128xf32>,
    return
  }
  func.func @transform_0(%arg0: i32, %arg1: i32) -> (i32, i32, i32) {
    %c1_i32 = arith.constant 1 : i32
    %0 = arith.muli %arg0, %c1_i32 : i32
    %1 = arith.addi %0, %arg1 : i32
    %c0_i32 = arith.constant 0 : i32
    %2 = arith.minsi %1, %c0_i32 : i32
    %c0_i32_0 = arith.constant 0 : i32
    %c0_i32_1 = arith.constant 0 : i32
    %c0_i32_2 = arith.constant 0 : i32
    return %c0_i32_0, %2, %c0_i32_1 : i32, i32, i32
  }
  func.func @transform_1(%arg0: i32, %arg1: i32) -> (i32, i32, i32) {
    %c1_i32 = arith.constant 1 : i32
    %0 = arith.muli %arg0, %c1_i32 : i32
    %1 = arith.addi %0, %arg1 : i32
    %c0_i32 = arith.constant 0 : i32
    %2 = arith.minsi %1, %c0_i32 : i32
    %c0_i32_0 = arith.constant 0 : i32
    %c0_i32_1 = arith.constant 0 : i32
    %c0_i32_2 = arith.constant 0 : i32
    return %c0_i32_0, %2, %c0_i32_1 : i32, i32, i32
  }
  func.func @transform_2(%arg0: i32, %arg1: i32) -> (i32, i32, i32) {
    %c0_i32 = arith.constant 0 : i32
    %c0_i32_0 = arith.constant 0 : i32
    %c0_i32_1 = arith.constant 0 : i32
    return %arg0, %c0_i32, %c0_i32_0 : i32, i32, i32
  }
  func.func @transform_3(%arg0: i32, %arg1: i32) -> (i32, i32, i32) {
    %c0_i32 = arith.constant 0 : i32
    %c0_i32_0 = arith.constant 0 : i32
    %c0_i32_1 = arith.constant 0 : i32
    return %arg0, %c0_i32, %c0_i32_0 : i32, i32, i32
  }
}

</mosaic_0001>

<bundles_post_ra>
// kernel: tpu_custom_call.1
= control target key start
LH: loop header
LB: loop body
LE: loop exit
PB: predicated region body
PF: predicated region fallthrough
CT: control target
= control target key end

     0   :  { %9 = vsyncpa [#allocation3], 0  ;;  %s324_s0 = inlined_call_operand.hbm [shape: f32[2,8,128], index: 0, kind: input, shape index: {}]   ;;  %s325_s1 = inlined_call_operand.hbm [shape: f32[2,8,128], index: 1, kind: input, shape index: {}]   ;;  %s326_s2 = inlined_call_operand.hbm [shape: f32[1,2,128], index: 2, kind: output, shape index: {0}]   ;;  %s327_s3 = inlined_call_operand.hbm [shape: f32[1,2,128], index: 3, kind: output, shape index: {1}]  }
   0x1   :  { %10 = vsyncpa [#allocation6], 0 }
   0x2   :  { %11 = vsyncpa [#allocation4], 0 }
   0x3   :  { %12 = vsyncpa [#allocation9], 0  ;;  %s249_s12 = smov [#allocation2]   ;;  %s153_s16 = scalar_lea.hbm %s324_s0, 256 }
   0x4   :  { %s23_s13 = sshll.u32 %s249_s12, 4  ;;  %p154_p0 = scmp.ne.s32.totalorder %s324_s0, %s153_s16  ;;  %s24_s13 = int_to_ptr.vmem [resolvable:$true] %s23_s13 }
   0x5   :  { %p157_p1 = scmp.lt.u32.totalorder %s153_s16, %s324_s0 }
   0x7   :  { %p159_p2 = pnand %p157_p1, %p154_p0 }
   0x9   :  { %162 = shalt.err (!%p159_p2)
}
   0xa   :  { %s163_s21 = scalar_lea.vmem %s24_s13, 256  ;;  %p168_p4 = scmp.lt.s32.totalorder %s24_s13, %s24_s13 }
   0xb   :  { %p164_p3 = scmp.ne.s32.totalorder %s24_s13, %s163_s21  ;;  %p169_p5 = scmp.lt.s32.totalorder %s163_s21, %s163_s21 }
   0xd   :  { %p170_p6 = por %p169_p5, %p168_p4 }
   0xf   :  { %p171_p7 = pnand %p170_p6, %p164_p3 }
  0x11   :  { %174 = shalt.err (!%p171_p7)
}
  0x12   :  { %s250_s22 = smov 128   ;;  %s251_s23 = smov 8  }
  0x13   :  { %29 = dma.hbm_to_vmem [thread:$0]  %s324_s0, 256, %s24_s13, [#allocation3], %s250_s22, %s250_s22, %s251_s23  }
  0x14   :  { %s252_s26 = smov [#allocation5]   ;;  %s175_s30 = scalar_lea.hbm %s325_s1, 256 }
  0x15   :  { %s40_s27 = sshll.u32 %s252_s26, 4  ;;  %p176_p8 = scmp.ne.s32.totalorder %s325_s1, %s175_s30  ;;  %s41_s27 = int_to_ptr.vmem [resolvable:$true] %s40_s27 }
  0x16   :  { %p179_p9 = scmp.lt.u32.totalorder %s175_s30, %s325_s1 }
  0x18   :  { %p181_p10 = pnand %p179_p9, %p176_p8 }
  0x1a   :  { %184 = shalt.err (!%p181_p10)
}
  0x1b   :  { %s185_s8 = scalar_lea.vmem %s41_s27, 256  ;;  %p190_p12 = scmp.lt.s32.totalorder %s41_s27, %s41_s27 }
  0x1c   :  { %p186_p11 = scmp.ne.s32.totalorder %s41_s27, %s185_s8  ;;  %p191_p13 = scmp.lt.s32.totalorder %s185_s8, %s185_s8 }
  0x1e   :  { %p192_p0 = por %p191_p13, %p190_p12 }
  0x20   :  { %p193_p1 = pnand %p192_p0, %p186_p11 }
  0x22   :  { %196 = shalt.err (!%p193_p1)
}
  0x23   :  { %46 = dma.hbm_to_vmem [thread:$0]  %s325_s1, 256, %s41_s27, [#allocation6], %s250_s22, %s250_s22, %s251_s23  }
  0x24   :  { %241 = dma.done.wait [#allocation3], 256  }
  0x25   :  { %242 = vsyncadd [#allocation3], 4294967040 }
  0x26   :  { %243 = dma.done.wait [#allocation6], 256  }
  0x27   :  { %244 = vsyncadd [#allocation6], 4294967040  ;;  %v253_v0 = vmov 0.0   ;;  %v65_v1 = vld [vmem:[#allocation2] sm:$0xff]  ;;  %v66_v2 = vld [vmem:[#allocation2 + $0x8] sm:$0xff]  ;;  %vm88_vm0 = vcmask 1041409  }
  0x28   :  { %63 = vst [vmem:[#allocation7] sm:$0x3] %v253_v0  ;;  %64 = vst [vmem:[#allocation8] sm:$0x3] %v253_v0  ;;  %v67_v3 = vld [vmem:[#allocation5] sm:$0xff]  ;;  %v68_v4 = vld [vmem:[#allocation5 + $0x8] sm:$0xff] }
  0x29   :  { %v69_v5 = vmul.f32 %v67_v3, %v65_v1  ;;  %v71_v6 = vadd.f32 %v67_v3, %v65_v1  ;;  %v70_v7 = vmul.f32 %v68_v4, %v66_v2  ;;  %v72_v8 = vadd.f32 %v68_v4, %v66_v2  ;;  %s254_s1 = smov [#allocation7]   ;;  %s255_s11 = smov [#allocation8]  }
  0x2a   :  { %s118_s10 = sshll.u32 %s254_s1, 4  ;;  %s128_s12 = sshll.u32 %s255_s11, 4  ;;  %s119_s10 = int_to_ptr.vmem [resolvable:$true] %s118_s10  ;;  %s129_s12 = int_to_ptr.vmem [resolvable:$true] %s128_s12 }
  0x2b   :  { %v74_v9 = vrot.slane %v69_v5, 4  ;;  %v94_v10 = vrot.slane %v71_v6, 4  ;;  %v80_v11 = vrot.slane %v70_v7, 4  ;;  %v100_v12 = vrot.slane %v72_v8, 4  ;;  %s197_s13 = scalar_lea.vmem %s119_s10, 32  ;;  %p202_p3 = scmp.lt.s32.totalorder %s119_s10, %s119_s10 }
  0x2c   :  { %p198_p2 = scmp.ne.s32.totalorder %s119_s10, %s197_s13  ;;  %p203_p4 = scmp.lt.s32.totalorder %s197_s13, %s197_s13 }
  0x2d   :  { %v75_v13 = vadd.f32 %v74_v9, %v69_v5  ;;  %v95_v14 = vadd.f32 %v94_v10, %v71_v6  ;;  %v81_v15 = vadd.f32 %v80_v11, %v70_v7  ;;  %v101_v16 = vadd.f32 %v100_v12, %v72_v8 }
  0x2e   :  { %p204_p5 = por %p203_p4, %p202_p3 }
  0x2f   :  { %v76_v17 = vrot.slane %v75_v13, 2  ;;  %v96_v18 = vrot.slane %v95_v14, 2  ;;  %v82_v19 = vrot.slane %v81_v15, 2  ;;  %v102_v20 = vrot.slane %v101_v16, 2  ;;  %v73_v31 = vld [vmem:[#allocation7] sm:$0x3] }
  0x30   :  { %v93_v33 = vld [vmem:[#allocation8] sm:$0x3]  ;;  %p205_p6 = pnand %p204_p5, %p198_p2 }
  0x31   :  { %v77_v21 = vadd.f32 %v76_v17, %v75_v13  ;;  %v97_v22 = vadd.f32 %v96_v18, %v95_v14  ;;  %v83_v23 = vadd.f32 %v82_v19, %v81_v15  ;;  %v103_v24 = vadd.f32 %v102_v20, %v101_v16 }
  0x33   :  { %v78_v25 = vrot.slane %v77_v21, 1  ;;  %v98_v26 = vrot.slane %v97_v22, 1  ;;  %v84_v27 = vrot.slane %v83_v23, 1  ;;  %v104_v28 = vrot.slane %v103_v24, 1 }
  0x35   :  { %v79_v29 = vadd.f32 %v78_v25, %v77_v21  ;;  %v99_v30 = vadd.f32 %v98_v26, %v97_v22  ;;  %v85_v32 = vadd.f32 %v84_v27, %v83_v23  ;;  %v105_v34 = vadd.f32 %v104_v28, %v103_v24 }
  0x37   :  { %v89_v35 = vsel %vm88_vm0, %v85_v32, %v79_v29  ;;  %v108_v36 = vsel %vm88_vm0, %v105_v34, %v99_v30 }
  0x38   :  { %v91_v37 = vadd.f32 %v89_v35, %v73_v31  ;;  %v110_v38 = vadd.f32 %v108_v36, %v93_v33 }
  0x3a   :  { %92 = vst [vmem:[#allocation7] sm:$0x3] %v91_v37  ;;  %111 = vst [vmem:[#allocation8] sm:$0x3] %v110_v38 }
  0x3b   :  { %208 = shalt.err (!%p205_p6)
}
  0x3c   :  { %s209_s16 = scalar_lea.hbm %s326_s2, 32 }
  0x3d   :  { %p210_p7 = scmp.ne.s32.totalorder %s326_s2, %s209_s16  ;;  %p213_p8 = scmp.lt.u32.totalorder %s209_s16, %s326_s2 }
  0x3f   :  { %p215_p9 = pnand %p213_p8, %p210_p7 }
  0x41   :  { %218 = shalt.err (!%p215_p9)
}
  0x42   :  { %121 = dma.vmem_to_hbm [thread:$0]  %s119_s10, 32, %s326_s2, [#allocation4]  }
  0x43   :  { %s219_s23 = scalar_lea.vmem %s129_s12, 32  ;;  %p224_p11 = scmp.lt.s32.totalorder %s129_s12, %s129_s12 }
  0x44   :  { %p220_p10 = scmp.ne.s32.totalorder %s129_s12, %s219_s23  ;;  %p225_p12 = scmp.lt.s32.totalorder %s219_s23, %s219_s23 }
  0x46   :  { %p226_p13 = por %p225_p12, %p224_p11 }
  0x48   :  { %p227_p0 = pnand %p226_p13, %p220_p10 }
  0x4a   :  { %230 = shalt.err (!%p227_p0)
}
  0x4b   :  { %s231_s26 = scalar_lea.hbm %s327_s3, 32 }
  0x4c   :  { %p232_p1 = scmp.ne.s32.totalorder %s327_s3, %s231_s26  ;;  %p235_p2 = scmp.lt.u32.totalorder %s231_s26, %s327_s3 }
  0x4e   :  { %p237_p3 = pnand %p235_p2, %p232_p1 }
  0x50   :  { %240 = shalt.err (!%p237_p3)
}
  0x51   :  { %131 = dma.vmem_to_hbm [thread:$0]  %s129_s12, 32, %s327_s3, [#allocation9]  }
  0x52   :  { %245 = dma.done.wait [#allocation4], 32  }
  0x53   :  { %246 = vsyncadd [#allocation4], 4294967264 }
  0x54   :  { %247 = dma.done.wait [#allocation9], 32  }
  0x55   :  { %248 = vsyncadd [#allocation9], 4294967264 }
  0x56   :  { %138 = vsyncpa [#allocation3], 1 }
  0x57   :  { %139 = vsyncpa [#allocation6], 1 }
  0x58   :  { %140 = vsyncpa [#allocation4], 1 }
  0x59   :  { %141 = vsyncpa [#allocation9], 1 }

</bundles_post_ra>
